<compile_context>
chip_gen: v5e
topology: v5e:2x2
jax: 0.10.0
libtpu: 0.0.40
codegen_flags: <defaults>
</compile_context>

<pallas_src>
import jax
import jax.numpy as jnp
from jax import lax
from jax.experimental import pallas as pl
from jax.experimental.pallas import tpu as pltpu

EMBEDDING_DIM = 1024   # module: self.embedding_dim = 1024
DROPOUT_P = 0.0        # module default: nn.Dropout(p=0.0) -> identity


def _make_proj_kernel(tm, seq_len, batch):
    """Kernel factory closing over static tile / layout parameters."""

    def kernel(len_ref,   # SMEM (B,)        int32 sentence lengths (prefetched)
               x_ref,     # VMEM (tm, D_in)  bf16 token features (row tile)
               w_ref,     # VMEM (D_in, D_out) bf16 projection weight (resident)
               b_ref,     # VMEM (1, D_out)  f32 projection bias (resident)
               o_ref):    # VMEM (tm, D_out) padded embeddings
        # Synthetic "embedder" projection to embedding_dim — MXU hot path,
        # bf16 operands, f32 accumulation.  Dropout(p=0.0) is the identity.
        y = jnp.dot(x_ref[...], w_ref[...], preferred_element_type=jnp.float32)
        y = y + b_ref[...]

        # pad_sequence(batch_first=True) semantics: flat row r is a real token
        # iff r lies in [b*T, b*T + lengths[b]) for some sentence b.  Lengths
        # live in SMEM; the per-sentence loop is statically unrolled (O(B)
        # vector compares on a (tm,1) vreg slice — free filler under the MXU).
        row0 = pl.program_id(0) * tm
        rows = row0 + lax.broadcasted_iota(jnp.int32, (tm, 1), 0)
        valid = jnp.zeros((tm, 1), dtype=jnp.bool_)
        for bi in range(batch):
            start = bi * seq_len
            li = len_ref[bi]
            valid = jnp.logical_or(
                valid, jnp.logical_and(rows >= start, rows < start + li))

        o_ref[...] = jnp.where(valid, y, 0.0).astype(o_ref.dtype)

    return kernel


def elmo_forward(token_ids, lengths, emb_table, proj_w, proj_b, *,
                 tm=1024, out_dtype=jnp.float32):
    """token_ids: [B, T] int32 (padded), lengths: [B] int32.

    Returns (padded_embeddings [B, T, 1024] out_dtype, masks [B, T] int32).
    Note: torch uses .long() (int64) masks; int32 is emitted here.
    out_dtype=jnp.bfloat16 halves HBM writeback (numerics tradeoff vs torch f32)."""
    B, T = token_ids.shape
    D_in = emb_table.shape[1]
    D_out = proj_w.shape[1]
    N = B * T

    # masks: torch.ones(len(e)).long() padded with zeros — trivial elementwise
    # op, computed in the wrapper (XLA) instead of inside the kernel.
    valid = lax.broadcasted_iota(jnp.int32, (B, T), 1) < lengths[:, None]
    mask = valid.astype(jnp.int32)

    # ---- row-tile selection (flattened (B*T, D_in) @ (D_in, D_out) matmul) ----
    tm = max(16, (min(tm, 1024) // 16) * 16)          # bf16-sublane-friendly
    if N > 16:
        # Prefer >=2 grid steps so both v7x TensorCores get work.
        half = max(16, (((N + 1) // 2) // 16) * 16)
        tm = min(tm, half)
    tm = min(tm, max(16, pl.cdiv(N, 16) * 16))        # don't over-tile tiny inputs
    n_pad = pl.cdiv(N, tm) * tm

    # Front end of the synthetic embedder: token-embedding gather from a
    # bf16 table (pre-cast once: halves the gather read and the size of the
    # materialized activation).  Only the int32 ids are padded to the tile
    # multiple — never the (N, D_in) activation itself.
    table_bf16 = (emb_table if emb_table.dtype == jnp.bfloat16
                  else emb_table.astype(jnp.bfloat16))
    ids = token_ids.reshape(N)
    if n_pad > N:
        ids = jnp.pad(ids, (0, n_pad - N))
    x = jnp.take(table_bf16, ids, axis=0)                          # (n_pad, D_in) bf16

    w = proj_w if proj_w.dtype == jnp.bfloat16 else proj_w.astype(jnp.bfloat16)
    bias = proj_b.reshape(1, D_out).astype(jnp.float32)

    grid_spec = pltpu.PrefetchScalarGridSpec(
        num_scalar_prefetch=1,                 # lengths -> SMEM, seen by index_maps
        grid=(n_pad // tm,),
        in_specs=[
            pl.BlockSpec((tm, D_in), lambda i, lens: (i, 0)),
            pl.BlockSpec((D_in, D_out), lambda i, lens: (0, 0)),   # resident weight
            pl.BlockSpec((1, D_out), lambda i, lens: (0, 0)),      # resident bias
        ],
        out_specs=pl.BlockSpec((tm, D_out), lambda i, lens: (i, 0)),
    )

    out_itemsize = jnp.dtype(out_dtype).itemsize
    cost = pl.CostEstimate(
        flops=2 * n_pad * D_in * D_out,
        transcendentals=0,
        bytes_accessed=(n_pad * D_in * 2            # x (bf16)
                        + D_in * D_out * 2          # weight (bf16)
                        + D_out * 4                 # bias (f32)
                        + n_pad * D_out * out_itemsize),  # output
    )

    emb_flat = pl.pallas_call(
        _make_proj_kernel(tm=tm, seq_len=T, batch=B),
        grid_spec=grid_spec,
        out_shape=jax.ShapeDtypeStruct((n_pad, D_out), out_dtype),
        compiler_params=pltpu.CompilerParams(
            dimension_semantics=("parallel",),     # independent row tiles
            vmem_limit_bytes=32 * 1024 * 1024),    # > v5e's 16 MiB default scoped,
                                                   # well under v7x's 64 MiB physical
        cost_estimate=cost,
    )(lengths.astype(jnp.int32), x, w, bias)

    emb = emb_flat[:N].reshape(B, T, D_out)
    return emb, mask


if __name__ == "__main__":
    key = jax.random.PRNGKey(0)
    k_emb, k_w, k_b, k_ids = jax.random.split(key, 4)

    B, T = 2, 8                 # 2 sentences, max length 8
    V, D_in = 50, 128           # synthetic vocab / token-feature width
    D_out = EMBEDDING_DIM       # 1024, per the module

    # Deterministic synthetic parameters (no checkpoint load).
    emb_table = jax.random.normal(k_emb, (V, D_in), dtype=jnp.float32) * 0.1
    proj_w = jax.random.normal(k_w, (D_in, D_out), dtype=jnp.float32) * 0.05
    proj_b = jax.random.normal(k_b, (D_out,), dtype=jnp.float32) * 0.01

    # Variable-length "sentences": lengths 8 and 5, padded with token 0.
    lengths = jnp.array([8, 5], dtype=jnp.int32)
    token_ids = jax.random.randint(k_ids, (B, T), 0, V, dtype=jnp.int32)
    pad_pos = lax.broadcasted_iota(jnp.int32, (B, T), 1) >= lengths[:, None]
    token_ids = jnp.where(pad_pos, 0, token_ids)

    emb, mask = elmo_forward(token_ids, lengths, emb_table, proj_w, proj_b)
    emb = jax.block_until_ready(emb)
    mask = jax.block_until_ready(mask)

    # Reference (plain JAX) with the same bf16 operand rounding + f32 accum.
    x_ref = jnp.take(emb_table, token_ids, axis=0)
    x_ref = x_ref.astype(jnp.bfloat16).astype(jnp.float32)
    w_ref = proj_w.astype(jnp.bfloat16).astype(jnp.float32)
    y_ref = jnp.einsum("btd,de->bte", x_ref, w_ref,
                       precision=lax.Precision.HIGHEST) + proj_b[None, None, :]
    valid = ~pad_pos
    y_ref = jnp.where(valid[:, :, None], y_ref, 0.0)
    mask_ref = valid.astype(jnp.int32)

    assert emb.shape == (B, T, D_out) and mask.shape == (B, T)
    assert jnp.allclose(emb, y_ref, atol=1e-3, rtol=1e-3), float(
        jnp.max(jnp.abs(emb - y_ref)))
    assert jnp.array_equal(mask, mask_ref)

    print("KERNEL_OK")
</pallas_src>

<mosaic_0001>
module attributes {stable_mosaic.version = 11 : i64} {
  func.func @kernel(%arg0: i32, %arg1: memref<2xi32, #tpu.memory_space<smem>>, %arg2: memref<16x128xbf16, #tpu.memory_space<vmem>>, %arg3: memref<128x1024xbf16, #tpu.memory_space<vmem>>, %arg4: memref<1x1024xf32, #tpu.memory_space<vmem>>, %arg5: memref<16x1024xf32, #tpu.memory_space<vmem>>) attributes {dimension_semantics = [#tpu.dimension_semantics<parallel>], iteration_bounds = array<i64: 1>, scalar_prefetch = 1 : i64, scratch_operands = 0 : i64, tpu.core_type = #tpu.core_type<tc>, window_params = [{transform_indices = @transform_0, window_bounds = array<i64: 16, 128>}, {pipeline_mode = #tpu.pipeline_mode<synchronous>, transform_indices = @transform_1, window_bounds = array<i64: 128, 1024>}, {pipeline_mode = #tpu.pipeline_mode<synchronous>, transform_indices = @transform_2, window_bounds = array<i64: 1, 1024>}, {transform_indices = @transform_3, window_bounds = array<i64: 16, 1024>}]} {
    %c0 = arith.constant 0 : index
    %c0_0 = arith.constant 0 : index
    %0 = vector.load %arg2[%c0, %c0_0] : memref<16x128xbf16, #tpu.memory_space<vmem>>, vector<16x128xbf16>
    %c0_1 = arith.constant 0 : index
    %c0_2 = arith.constant 0 : index
    %1 = vector.load %arg3[%c0_1, %c0_2] : memref<128x1024xbf16, #tpu.memory_space<vmem>>, vector<128x1024xbf16>
    %cst = arith.constant dense<0.000000e+00> : vector<16x1024xf32>
    %2 = tpu.matmul %0, %1, %cst {dimension_numbers = #tpu.dot_dimension_numbers<[1], [0], [0], [1], [0, 0, 1, 1], [], []>} : vector<16x128xbf16>, vector<128x1024xbf16>, vector<16x1024xf32> -> vector<16x1024xf32>
    %c0_3 = arith.constant 0 : index
    %c0_4 = arith.constant 0 : index
    %3 = vector.load %arg4[%c0_3, %c0_4] : memref<1x1024xf32, #tpu.memory_space<vmem>>, vector<1x1024xf32>
    %4 = vector.broadcast %3 : vector<1x1024xf32> to vector<16x1024xf32>
    %5 = arith.addf %2, %4 : vector<16x1024xf32>
    %c16_i32 = arith.constant 16 : i32
    %6 = arith.muli %arg0, %c16_i32 : i32
    %7 = tpu.iota {dimensions = array<i32: 0>} : vector<16x1xi32>
    %8 = vector.broadcast %6 : i32 to vector<16x1xi32>
    %9 = arith.addi %8, %7 : vector<16x1xi32>
    %false = arith.constant false
    %10 = vector.broadcast %false : i1 to vector<16x1xi1>
    %c0_5 = arith.constant 0 : index
    %11 = memref.load %arg1[%c0_5] : memref<2xi32, #tpu.memory_space<smem>>
    %c0_i32 = arith.constant 0 : i32
    %12 = vector.broadcast %c0_i32 : i32 to vector<16x1xi32>
    %13 = arith.cmpi sge, %9, %12 : vector<16x1xi32>
    %c0_i32_6 = arith.constant 0 : i32
    %14 = arith.addi %c0_i32_6, %11 : i32
    %15 = vector.broadcast %14 : i32 to vector<16x1xi32>
    %16 = arith.cmpi slt, %9, %15 : vector<16x1xi32>
    %17 = arith.andi %13, %16 : vector<16x1xi1>
    %18 = arith.ori %10, %17 : vector<16x1xi1>
    %c1 = arith.constant 1 : index
    %19 = memref.load %arg1[%c1] : memref<2xi32, #tpu.memory_space<smem>>
    %c8_i32 = arith.constant 8 : i32
    %20 = vector.broadcast %c8_i32 : i32 to vector<16x1xi32>
    %21 = arith.cmpi sge, %9, %20 : vector<16x1xi32>
    %c8_i32_7 = arith.constant 8 : i32
    %22 = arith.addi %c8_i32_7, %19 : i32
    %23 = vector.broadcast %22 : i32 to vector<16x1xi32>
    %24 = arith.cmpi slt, %9, %23 : vector<16x1xi32>
    %25 = arith.andi %21, %24 : vector<16x1xi1>
    %26 = arith.ori %18, %25 : vector<16x1xi1>
    %cst_8 = arith.constant 0.000000e+00 : f32
    %27 = vector.shape_cast %26 : vector<16x1xi1> to vector<16x1xi1>
    %28 = vector.broadcast %27 : vector<16x1xi1> to vector<16x1024xi1>
    %29 = vector.broadcast %cst_8 : f32 to vector<16x1024xf32>
    %30 = arith.select %28, %5, %29 : vector<16x1024xi1>, vector<16x1024xf32>
    %c0_9 = arith.constant 0 : index
    %c0_10 = arith.constant 0 : index
    %31 = vector.load %arg5[%c0_9, %c0_10] : memref<16x1024xf32, #tpu.memory_space<vmem>>, vector<16x1024xf32>
    tpu.vector_store %arg5[%c0_9, %c0_10], %30 {strides = array<i32>} : memref<16x1024xf32, #tpu.memory_space<vmem>>, vector<16x1024xf32>,
    return
  }
  func.func @transform_0(%arg0: i32, %arg1: memref<2xi32, #tpu.memory_space<smem>>) -> (i32, i32) {
    %c0_i32 = arith.constant 0 : i32
    %c0_i32_0 = arith.constant 0 : i32
    return %arg0, %c0_i32 : i32, i32
  }
  func.func @transform_1(%arg0: i32, %arg1: memref<2xi32, #tpu.memory_space<smem>>) -> (i32, i32) {
    %c0_i32 = arith.constant 0 : i32
    %c0_i32_0 = arith.constant 0 : i32
    %c0_i32_1 = arith.constant 0 : i32
    return %c0_i32, %c0_i32_0 : i32, i32
  }
  func.func @transform_2(%arg0: i32, %arg1: memref<2xi32, #tpu.memory_space<smem>>) -> (i32, i32) {
    %c0_i32 = arith.constant 0 : i32
    %c0_i32_0 = arith.constant 0 : i32
    %c0_i32_1 = arith.constant 0 : i32
    return %c0_i32, %c0_i32_0 : i32, i32
  }
  func.func @transform_3(%arg0: i32, %arg1: memref<2xi32, #tpu.memory_space<smem>>) -> (i32, i32) {
    %c0_i32 = arith.constant 0 : i32
    %c0_i32_0 = arith.constant 0 : i32
    return %arg0, %c0_i32 : i32, i32
  }
}

</mosaic_0001>

<bundles_post_ra>
// kernel: tpu_custom_call.1
= control target key start
LH: loop header
LB: loop body
LE: loop exit
PB: predicated region body
PF: predicated region fallthrough
CT: control target
= control target key end

     0   :  { %s1125_s18 = smov [#allocation3]   ;;  %s1238_s0 = inlined_call_operand.hbm [shape: s32[2], index: 0, kind: input, shape index: {}]   ;;  %s1239_s1 = inlined_call_operand.hbm [shape: bf16[16,128], index: 1, kind: input, shape index: {}]   ;;  %s1240_s2 = inlined_call_operand.hbm [shape: bf16[128,1024], index: 2, kind: input, shape index: {}]   ;;  %s1241_s3 = inlined_call_operand.hbm [shape: f32[1,1024], index: 3, kind: input, shape index: {}]   ;;  %s1242_s4 = inlined_call_operand.hbm [shape: f32[16,1024], index: 4, kind: output, shape index: {}]  }
   0x1   :  { %s10_s17 = sshll.u32 %s1238_s0, 4  ;;  %s11_s17 = int_to_ptr.hbm [resolvable:$true] %s10_s17 }
   0x2   :  { %13 = dma.hbm_to_smem %s11_s17, 16, %s1125_s18, [#allocation2] }
   0x3   :  { %1117 = dma.done.wait [#allocation2], 16 }
   0x4   :  { %1118 = vsyncadd [#allocation2], 4294967280 }
   0x5   :  { %16 = sfence }
   0x6   :  { %17 = vsyncpa [#allocation5], 0 }
   0x7   :  { %18 = vsyncpa [#allocation8], 0  ;;  %s37_s21 = sshll.u32 %s1240_s2, 4  ;;  %s38_s21 = int_to_ptr.hbm [resolvable:$true] %s37_s21 }
   0x8   :  { %19 = vsyncpa [#allocation6], 0  ;;  %s1126_s22 = smov [#allocation7]   ;;  %s24_s0 = sshll.u32 %s1239_s1, 4  ;;  %s25_s0 = int_to_ptr.hbm [resolvable:$true] %s24_s0 }
   0x9   :  { %s39_s23 = sshll.u32 %s1126_s22, 4  ;;  %s1127_s26 = smov 512   ;;  %s40_s23 = int_to_ptr.vmem [resolvable:$true] %s39_s23 }
   0xa   :  { %s1128_s27 = smov 32   ;;  %s1129_s28 = smov [#allocation4]  }
   0xb   :  { %45 = dma.hbm_to_vmem [thread:$0]  %s38_s21, 8192, %s40_s23, [#allocation8], %s1127_s26, %s1127_s26, %s1128_s27  }
   0xc   :  { %s26_s29 = sshll.u32 %s1129_s28, 4  ;;  %s1130_s30 = smov 64   ;;  %s27_s29 = int_to_ptr.vmem [resolvable:$true] %s26_s29 }
   0xd   :  { %s1131_s5 = smov 4   ;;  %s51_s7 = sshll.u32 %s1241_s3, 4  ;;  %s52_s7 = int_to_ptr.hbm [resolvable:$true] %s51_s7 }
   0xe   :  { %32 = dma.hbm_to_vmem [thread:$0]  %s25_s0, 128, %s27_s29, [#allocation5], %s1130_s30, %s1130_s30, %s1131_s5  }
   0xf   :  { %s1132_s8 = smov [#allocation9]  }
  0x10   :  { %s53_s9 = sshll.u32 %s1132_s8, 4  ;;  %s54_s9 = int_to_ptr.vmem [resolvable:$true] %s53_s9 }
  0x11   :  { %56 = dma.hbm_to_vmem [thread:$0]  %s52_s7, 128, %s54_s9, [#allocation8]  }
  0x12   :  { %1119 = dma.done.wait [#allocation5], 128  }
  0x13   :  { %1120 = vsyncadd [#allocation5], 4294967168 }
  0x14   :  { %1121 = dma.done.wait [#allocation8], 8320  }
  0x15   :  { %1122 = vsyncadd [#allocation8], 4294958976  ;;  %v903_v0 = vld [vmem:[#allocation7 + $0x1c0] sm:$0xf]  ;;  %v991_v2 = vld [vmem:[#allocation7 + $0x1c4] sm:$0xf] }
  0x16   :  { %v995_v1 = vld [vmem:[#allocation7 + $0x1dc] sm:$0xf0]  ;;  %v905_v4 = vld [vmem:[#allocation7 + $0x1e0] sm:$0xf0]  ;;  %v911_v5 = vld [vmem:[#allocation7 + $0x1c8] sm:$0xf] }
  0x17   :  { %v904_v3 = vor.u32 %v995_v1, %v903_v0  ;;  %v996_v6 = vld [vmem:[#allocation7 + $0x1e4] sm:$0xf0]  ;;  %v908_v7 = vor.u32 %v991_v2, %v905_v4  ;;  %v992_v9 = vld [vmem:[#allocation7 + $0x1cc] sm:$0xf]  ;;  %v871_v11 = vld [vmem:[#allocation7 + $0x180] sm:$0xf] }
  0x18   :  { %v912_v8 = vor.u32 %v996_v6, %v911_v5  ;;  %v913_v10 = vld [vmem:[#allocation7 + $0x1e8] sm:$0xf0]  ;;  %v987_v13 = vld [vmem:[#allocation7 + $0x19c] sm:$0xf0]  ;;  %v983_v14 = vld [vmem:[#allocation7 + $0x184] sm:$0xf] }
  0x19   :  { %479 = vmatpush.bf16.msra.mxu0 %v904_v3  ;;  %v916_v12 = vor.u32 %v992_v9, %v913_v10  ;;  %v873_v15 = vld [vmem:[#allocation7 + $0x1a0] sm:$0xf0]  ;;  %493 = vmatpush.bf16.msra.mxu1 %v908_v7  ;;  %v872_v16 = vor.u32 %v987_v13, %v871_v11  ;;  %v879_v18 = vld [vmem:[#allocation7 + $0x188] sm:$0xf]  ;;  %v984_v20 = vld [vmem:[#allocation7 + $0x18c] sm:$0xf] }
  0x1a   :  { %507 = vmatpush.bf16.msra.mxu2 %v912_v8  ;;  %v876_v17 = vor.u32 %v983_v14, %v873_v15  ;;  %v988_v19 = vld [vmem:[#allocation7 + $0x1a4] sm:$0xf0]  ;;  %v881_v22 = vld [vmem:[#allocation7 + $0x1a8] sm:$0xf0]  ;;  %v839_v23 = vld [vmem:[#allocation7 + $0x140] sm:$0xf] }
  0x1b   :  { %521 = vmatpush.bf16.msra.mxu3 %v916_v12  ;;  %v880_v21 = vor.u32 %v988_v19, %v879_v18  ;;  %v979_v24 = vld [vmem:[#allocation7 + $0x15c] sm:$0xf0]  ;;  %v884_v25 = vor.u32 %v984_v20, %v881_v22  ;;  %v975_v26 = vld [vmem:[#allocation7 + $0x144] sm:$0xf]  ;;  %v847_v28 = vld [vmem:[#allocation7 + $0x148] sm:$0xf] }
  0x1c   :  { %v841_v27 = vld [vmem:[#allocation7 + $0x160] sm:$0xf0]  ;;  %v840_v29 = vor.u32 %v979_v24, %v839_v23  ;;  %v980_v30 = vld [vmem:[#allocation7 + $0x164] sm:$0xf0]  ;;  %v976_v31 = vld [vmem:[#allocation7 + $0x14c] sm:$0xf] }
  0x1d   :  { %480 = vmatpush.bf16.msra.mxu0 %v872_v16  ;;  %v849_v32 = vld [vmem:[#allocation7 + $0x168] sm:$0xf0]  ;;  %494 = vmatpush.bf16.msra.mxu1 %v876_v17  ;;  %v844_v33 = vor.u32 %v975_v26, %v841_v27  ;;  %v848_v34 = vor.u32 %v980_v30, %v847_v28  ;;  %v807_v35 = vld [vmem:[#allocation7 + $0x100] sm:$0xf]  ;;  %v967_v37 = vld [vmem:[#allocation7 + $0x104] sm:$0xf] }
  0x1e   :  { %508 = vmatpush.bf16.msra.mxu2 %v880_v21  ;;  %v971_v36 = vld [vmem:[#allocation7 + $0x11c] sm:$0xf0]  ;;  %v852_v38 = vor.u32 %v976_v31, %v849_v32  ;;  %v809_v39 = vld [vmem:[#allocation7 + $0x120] sm:$0xf0]  ;;  %v815_v40 = vld [vmem:[#allocation7 + $0x108] sm:$0xf] }
  0x1f   :  { %522 = vmatpush.bf16.msra.mxu3 %v884_v25  ;;  %v972_v41 = vld [vmem:[#allocation7 + $0x124] sm:$0xf0]  ;;  %v968_v42 = vld [vmem:[#allocation7 + $0x10c] sm:$0xf]  ;;  %v808_v44 = vor.u32 %v971_v36, %v807_v35  ;;  %v812_v45 = vor.u32 %v967_v37, %v809_v39  ;;  %v775_v47 = vld [vmem:[#allocation7 + $0xc0] sm:$0xf] }
  0x20   :  { %v817_v43 = vld [vmem:[#allocation7 + $0x128] sm:$0xf0]  ;;  %v816_v46 = vor.u32 %v972_v41, %v815_v40  ;;  %v963_v48 = vld [vmem:[#allocation7 + $0xdc] sm:$0xf0]  ;;  %v959_v49 = vld [vmem:[#allocation7 + $0xc4] sm:$0xf] }
  0x21   :  { %481 = vmatpush.bf16.msra.mxu0 %v840_v29  ;;  %495 = vmatpush.bf16.msra.mxu1 %v844_v33  ;;  %v820_v50 = vor.u32 %v968_v42, %v817_v43  ;;  %v777_v51 = vld [vmem:[#allocation7 + $0xe0] sm:$0xf0]  ;;  %v783_v52 = vld [vmem:[#allocation7 + $0xc8] sm:$0xf]  ;;  %v960_v54 = vld [vmem:[#allocation7 + $0xcc] sm:$0xf]  ;;  %v776_v56 = vor.u32 %v963_v48, %v775_v47 }
  0x22   :  { %509 = vmatpush.bf16.msra.mxu2 %v848_v34  ;;  %v964_v53 = vld [vmem:[#allocation7 + $0xe4] sm:$0xf0]  ;;  %v785_v55 = vld [vmem:[#allocation7 + $0xe8] sm:$0xf0]  ;;  %v780_v57 = vor.u32 %v959_v49, %v777_v51  ;;  %v743_v59 = vld [vmem:[#allocation7 + $0x80] sm:$0xf] }
  0x23   :  { %523 = vmatpush.bf16.msra.mxu3 %v852_v38  ;;  %v784_v58 = vor.u32 %v964_v53, %v783_v52  ;;  %v955_v60 = vld [vmem:[#allocation7 + $0x9c] sm:$0xf0]  ;;  %v951_v61 = vld [vmem:[#allocation7 + $0x84] sm:$0xf]  ;;  %v788_v62 = vor.u32 %v960_v54, %v785_v55  ;;  %v751_v0 = vld [vmem:[#allocation7 + $0x88] sm:$0xf] }
  0x24   :  { %v745_v63 = vld [vmem:[#allocation7 + $0xa0] sm:$0xf0]  ;;  %v956_v1 = vld [vmem:[#allocation7 + $0xa4] sm:$0xf0]  ;;  %v952_v2 = vld [vmem:[#allocation7 + $0x8c] sm:$0xf]  ;;  %v744_v4 = vor.u32 %v955_v60, %v743_v59 }
  0x25   :  { %482 = vmatpush.bf16.msra.mxu0 %v808_v44  ;;  %496 = vmatpush.bf16.msra.mxu1 %v812_v45  ;;  %v753_v3 = vld [vmem:[#allocation7 + $0xa8] sm:$0xf0]  ;;  %v748_v5 = vor.u32 %v951_v61, %v745_v63  ;;  %v752_v6 = vor.u32 %v956_v1, %v751_v0  ;;  %v711_v7 = vld [vmem:[#allocation7 + $0x40] sm:$0xf]  ;;  %v943_v9 = vld [vmem:[#allocation7 + $0x44] sm:$0xf] }
  0x26   :  { %510 = vmatpush.bf16.msra.mxu2 %v816_v46  ;;  %v947_v8 = vld [vmem:[#allocation7 + $0x5c] sm:$0xf0]  ;;  %v756_v10 = vor.u32 %v952_v2, %v753_v3  ;;  %v713_v11 = vld [vmem:[#allocation7 + $0x60] sm:$0xf0]  ;;  %v719_v12 = vld [vmem:[#allocation7 + $0x48] sm:$0xf] }
  0x27   :  { %524 = vmatpush.bf16.msra.mxu3 %v820_v50  ;;  %v948_v13 = vld [vmem:[#allocation7 + $0x64] sm:$0xf0]  ;;  %v944_v14 = vld [vmem:[#allocation7 + $0x4c] sm:$0xf]  ;;  %v712_v16 = vor.u32 %v947_v8, %v711_v7  ;;  %v679_v17 = vld [vmem:[#allocation7] sm:$0xf]  ;;  %v716_v19 = vor.u32 %v943_v9, %v713_v11 }
  0x28   :  { %v721_v15 = vld [vmem:[#allocation7 + $0x68] sm:$0xf0]  ;;  %v939_v18 = vld [vmem:[#allocation7 + $0x1c] sm:$0xf0]  ;;  %v720_v20 = vor.u32 %v948_v13, %v719_v12  ;;  %v935_v21 = vld [vmem:[#allocation7 + $0x4] sm:$0xf] }
  0x29   :  { %483 = vmatpush.bf16.msra.mxu0 %v776_v56  ;;  %497 = vmatpush.bf16.msra.mxu1 %v780_v57  ;;  %v681_v22 = vld [vmem:[#allocation7 + $0x20] sm:$0xf0]  ;;  %v687_v23 = vld [vmem:[#allocation7 + $0x8] sm:$0xf]  ;;  %v724_v24 = vor.u32 %v944_v14, %v721_v15  ;;  %v936_v26 = vld [vmem:[#allocation7 + $0xc] sm:$0xf]  ;;  %v680_v31 = vor.u32 %v939_v18, %v679_v17 }
  0x2a   :  { %511 = vmatpush.bf16.msra.mxu2 %v784_v58  ;;  %v940_v25 = vld [vmem:[#allocation7 + $0x24] sm:$0xf0]  ;;  %v689_v27 = vld [vmem:[#allocation7 + $0x28] sm:$0xf0]  ;;  %v919_v28 = vld [vmem:[#allocation7 + $0x1d0] sm:$0xf]  ;;  %v684_v35 = vor.u32 %v935_v21, %v681_v22 }
  0x2b   :  { %525 = vmatpush.bf16.msra.mxu3 %v788_v62  ;;  %v997_v29 = vld [vmem:[#allocation7 + $0x1ec] sm:$0xf0]  ;;  %v993_v30 = vld [vmem:[#allocation7 + $0x1d4] sm:$0xf]  ;;  %v927_v33 = vld [vmem:[#allocation7 + $0x1d8] sm:$0xf]  ;;  %v688_v36 = vor.u32 %v940_v25, %v687_v23  ;;  %v692_v39 = vor.u32 %v936_v26, %v689_v27 }
  0x2c   :  { %v921_v32 = vld [vmem:[#allocation7 + $0x1f0] sm:$0xf0]  ;;  %v998_v34 = vld [vmem:[#allocation7 + $0x1f4] sm:$0xf0]  ;;  %v994_v37 = vld [vmem:[#allocation7 + $0x1dc] sm:$0xf]  ;;  %v920_v40 = vor.u32 %v997_v29, %v919_v28 }
  0x2d   :  { %484 = vmatpush.bf16.msra.mxu0 %v744_v4  ;;  %498 = vmatpush.bf16.msra.mxu1 %v748_v5  ;;  %v929_v38 = vld [vmem:[#allocation7 + $0x1f8] sm:$0xf0]  ;;  %v887_v41 = vld [vmem:[#allocation7 + $0x190] sm:$0xf]  ;;  %v924_v42 = vor.u32 %v993_v30, %v921_v32  ;;  %v928_v43 = vor.u32 %v998_v34, %v927_v33  ;;  %v985_v45 = vld [vmem:[#allocation7 + $0x194] sm:$0xf] }
  0x2e   :  { %512 = vmatpush.bf16.msra.mxu2 %v752_v6  ;;  %v989_v44 = vld [vmem:[#allocation7 + $0x1ac] sm:$0xf0]  ;;  %v889_v46 = vld [vmem:[#allocation7 + $0x1b0] sm:$0xf0]  ;;  %v932_v47 = vor.u32 %v994_v37, %v929_v38  ;;  %v895_v48 = vld [vmem:[#allocation7 + $0x198] sm:$0xf] }
  0x2f   :  { %526 = vmatpush.bf16.msra.mxu3 %v756_v10  ;;  %v990_v49 = vld [vmem:[#allocation7 + $0x1b4] sm:$0xf0]  ;;  %v986_v51 = vld [vmem:[#allocation7 + $0x19c] sm:$0xf]  ;;  %v888_v53 = vor.u32 %v989_v44, %v887_v41  ;;  %v892_v54 = vor.u32 %v985_v45, %v889_v46  ;;  %v855_v56 = vld [vmem:[#allocation7 + $0x150] sm:$0xf] }
  0x30   :  { %v1174_v50 = vld [vmem:[#allocation4] sm:$0xff]  ;;  %v896_v55 = vor.u32 %v990_v49, %v895_v48  ;;  %v981_v57 = vld [vmem:[#allocation7 + $0x16c] sm:$0xf0]  ;;  %v977_v58 = vld [vmem:[#allocation7 + $0x154] sm:$0xf]  ;;  %s598_s1 = sld [smem:[#allocation3]] }
  0x31   :  { %485 = vmatpush.bf16.msra.mxu0 %v712_v16  ;;  %499 = vmatpush.bf16.msra.mxu1 %v716_v19  ;;  %v897_v52 = vld [vmem:[#allocation7 + $0x1b8] sm:$0xf0]  ;;  %v857_v60 = vld [vmem:[#allocation7 + $0x170] sm:$0xf0]  ;;  %v863_v61 = vld [vmem:[#allocation7 + $0x158] sm:$0xf]  ;;  %v856_v1 = vor.u32 %v981_v57, %v855_v56 }
  0x32   :  { %513 = vmatpush.bf16.msra.mxu2 %v720_v20  ;;  %v900_v59 = vor.u32 %v986_v51, %v897_v52  ;;  %v982_v62 = vld [vmem:[#allocation7 + $0x174] sm:$0xf0]  ;;  %v978_v63 = vld [vmem:[#allocation7 + $0x15c] sm:$0xf]  ;;  %v860_v2 = vor.u32 %v977_v58, %v857_v60  ;;  %v823_v4 = vld [vmem:[#allocation7 + $0x110] sm:$0xf] }
  0x33   :  { %527 = vmatpush.bf16.msra.mxu3 %v724_v24  ;;  %v865_v0 = vld [vmem:[#allocation7 + $0x178] sm:$0xf0]  ;;  %v864_v3 = vor.u32 %v982_v62, %v863_v61  ;;  %v973_v5 = vld [vmem:[#allocation7 + $0x12c] sm:$0xf0]  ;;  %v969_v6 = vld [vmem:[#allocation7 + $0x114] sm:$0xf] }
  0x34   :  { %v868_v7 = vor.u32 %v978_v63, %v865_v0  ;;  %v825_v8 = vld [vmem:[#allocation7 + $0x130] sm:$0xf0]  ;;  %v831_v9 = vld [vmem:[#allocation7 + $0x118] sm:$0xf]  ;;  %v970_v11 = vld [vmem:[#allocation7 + $0x11c] sm:$0xf]  ;;  %v824_v13 = vor.u32 %v973_v5, %v823_v4 }
  0x35   :  { %486 = vmatpush.bf16.msra.mxu0 %v680_v31  ;;  %500 = vmatpush.bf16.msra.mxu1 %v684_v35  ;;  %v974_v10 = vld [vmem:[#allocation7 + $0x134] sm:$0xf0]  ;;  %v833_v12 = vld [vmem:[#allocation7 + $0x138] sm:$0xf0]  ;;  %v828_v14 = vor.u32 %v969_v6, %v825_v8  ;;  %v791_v16 = vld [vmem:[#allocation7 + $0xd0] sm:$0xf] }
  0x36   :  { %514 = vmatpush.bf16.msra.mxu2 %v688_v36  ;;  %v832_v15 = vor.u32 %v974_v10, %v831_v9  ;;  %v965_v17 = vld [vmem:[#allocation7 + $0xec] sm:$0xf0]  ;;  %v961_v18 = vld [vmem:[#allocation7 + $0xd4] sm:$0xf]  ;;  %v836_v19 = vor.u32 %v970_v11, %v833_v12  ;;  %v799_v21 = vld [vmem:[#allocation7 + $0xd8] sm:$0xf]  ;;  %v601_v6 = vstv %s598_s1 }
  0x37   :  { %528 = vmatpush.bf16.msra.mxu3 %v692_v39  ;;  %v793_v20 = vld [vmem:[#allocation7 + $0xf0] sm:$0xf0]  ;;  %v966_v22 = vld [vmem:[#allocation7 + $0xf4] sm:$0xf0]  ;;  %v962_v23 = vld [vmem:[#allocation7 + $0xdc] sm:$0xf]  ;;  %v792_v25 = vor.u32 %v965_v17, %v791_v16 }
  0x38   :  { %487 = vmatmul.bf16.vlgmr.msra.gmra.mxu0 %v1174_v50  ;;  %501 = vmatmul.bf16.vlgmr.msra.gmra.mxu1 %v1174_v50  ;;  %v801_v24 = vld [vmem:[#allocation7 + $0xf8] sm:$0xf0]  ;;  %v796_v26 = vor.u32 %v961_v18, %v793_v20  ;;  %v800_v27 = vor.u32 %v966_v22, %v799_v21  ;;  %v759_v28 = vld [vmem:[#allocation7 + $0x90] sm:$0xf]  ;;  %v953_v30 = vld [vmem:[#allocation7 + $0x94] sm:$0xf] }
  0x39   :  { %535 = vmatpush.bf16.msrb.mxu0 %v920_v40  ;;  %549 = vmatpush.bf16.msrb.mxu1 %v924_v42  ;;  %v957_v29 = vld [vmem:[#allocation7 + $0xac] sm:$0xf0]  ;;  %v804_v31 = vor.u32 %v962_v23, %v801_v24  ;;  %v761_v32 = vld [vmem:[#allocation7 + $0xb0] sm:$0xf0]  ;;  %v767_v33 = vld [vmem:[#allocation7 + $0x98] sm:$0xf] }
  0x3a   :  { %563 = vmatpush.bf16.msrb.mxu2 %v928_v43  ;;  %529 = vmatmul.bf16.vlgmr.msra.gmra.mxu3 %v1174_v50  ;;  %v958_v34 = vld [vmem:[#allocation7 + $0xb4] sm:$0xf0]  ;;  %v954_v35 = vld [vmem:[#allocation7 + $0x9c] sm:$0xf]  ;;  %v760_v37 = vor.u32 %v957_v29, %v759_v28  ;;  %v764_v38 = vor.u32 %v953_v30, %v761_v32  ;;  %v727_v40 = vld [vmem:[#allocation7 + $0x50] sm:$0xf] }
  0x3b   :  { %577 = vmatpush.bf16.msrb.mxu3 %v932_v47  ;;  %515 = vmatmul.bf16.vlgmr.msra.gmra.mxu2 %v1174_v50  ;;  %v769_v36 = vld [vmem:[#allocation7 + $0xb8] sm:$0xf0]  ;;  %v768_v39 = vor.u32 %v958_v34, %v767_v33  ;;  %v949_v41 = vld [vmem:[#allocation7 + $0x6c] sm:$0xf0]  ;;  %v945_v42 = vld [vmem:[#allocation7 + $0x54] sm:$0xf] }
  0x3c   :  { %v772_v43 = vor.u32 %v954_v35, %v769_v36  ;;  %v729_v44 = vld [vmem:[#allocation7 + $0x70] sm:$0xf0]  ;;  %v735_v45 = vld [vmem:[#allocation7 + $0x58] sm:$0xf]  ;;  %v946_v47 = vld [vmem:[#allocation7 + $0x5c] sm:$0xf]  ;;  %v728_v49 = vor.u32 %v949_v41, %v727_v40 }
  0x3d   :  { %536 = vmatpush.bf16.msrb.mxu0 %v888_v53  ;;  %550 = vmatpush.bf16.msrb.mxu1 %v892_v54  ;;  %v950_v46 = vld [vmem:[#allocation7 + $0x74] sm:$0xf0]  ;;  %v737_v48 = vld [vmem:[#allocation7 + $0x78] sm:$0xf0]  ;;  %v732_v51 = vor.u32 %v945_v42, %v729_v44  ;;  %v695_v53 = vld [vmem:[#allocation7 + $0x10] sm:$0xf] }
  0x3e   :  { %564 = vmatpush.bf16.msrb.mxu2 %v896_v55  ;;  %v736_v52 = vor.u32 %v950_v46, %v735_v45  ;;  %v941_v54 = vld [vmem:[#allocation7 + $0x2c] sm:$0xf0]  ;;  %v937_v55 = vld [vmem:[#allocation7 + $0x14] sm:$0xf]  ;;  %v740_v56 = vor.u32 %v946_v47, %v737_v48  ;;  %v703_v58 = vld [vmem:[#allocation7 + $0x18] sm:$0xf] }
  0x3f   :  { %578 = vmatpush.bf16.msrb.mxu3 %v900_v59  ;;  %v697_v57 = vld [vmem:[#allocation7 + $0x30] sm:$0xf0]  ;;  %v942_v59 = vld [vmem:[#allocation7 + $0x34] sm:$0xf0]  ;;  %v938_v60 = vld [vmem:[#allocation7 + $0x1c] sm:$0xf]  ;;  %v696_v62 = vor.u32 %v941_v54, %v695_v53 }
  0x40   :  { %v705_v61 = vld [vmem:[#allocation7 + $0x38] sm:$0xf0]  ;;  %v700_v63 = vor.u32 %v937_v55, %v697_v57  ;;  %v704_v0 = vor.u32 %v942_v59, %v703_v58  ;;  %s933_s3 = sld [smem:[#allocation3 + $0x1]]  ;;  %s1133_s11 = smov [#allocation10]  }
  0x41   :  { %537 = vmatpush.bf16.msrb.mxu0 %v856_v1  ;;  %551 = vmatpush.bf16.msrb.mxu1 %v860_v2  ;;  %v708_v1 = vor.u32 %v938_v60, %v705_v61  ;;  %v592_v2 = vlaneseq  ;;  %s657_s12 = sshll.u32 %s1133_s11, 4  ;;  %s659_s15 = sshll.u32 %s1242_s4, 4  ;;  %s658_s12 = int_to_ptr.vmem [resolvable:$true] %s657_s12  ;;  %s660_s15 = int_to_ptr.hbm [resolvable:$true] %s659_s15 }
  0x42   :  { %565 = vmatpush.bf16.msrb.mxu2 %v864_v3  ;;  %v1184_v3 = vld [vmem:[#allocation9] sm:$0xff]  ;;  %s1134_s16 = smov 1024  }
  0x43   :  { %579 = vmatpush.bf16.msrb.mxu3 %v868_v7  ;;  %v137_v4 = vperm.slane %v1184_v3, 0  ;;  %v593_v5 = vshrl.u32 %v592_v2, 7  ;;  %v138_v7 = vperm.slane %v1184_v3, 1  ;;  %v140_v16 = vperm.slane %v1184_v3, 3 }
  0x44   :  { %v143_v45 = vperm.slane %v1184_v3, 6  ;;  %v144_v46 = vperm.slane %v1184_v3, 7 }
  0x45   :  { %538 = vmatpush.bf16.msrb.mxu0 %v824_v13  ;;  %552 = vmatpush.bf16.msrb.mxu1 %v828_v14  ;;  %vm1188_vm0 = vcmp.lt.s32.totalorder %v593_v5, %v601_v6  ;;  %v139_v13 = vperm.slane %v1184_v3, 2 }
  0x46   :  { %566 = vmatpush.bf16.msrb.mxu2 %v832_v15  ;;  %s609_s10 = sadd.s32 8, %s933_s3 }
  0x47   :  { %580 = vmatpush.bf16.msrb.mxu3 %v836_v19  ;;  %v610_v14 = vstv %s609_s10 }
  0x49   :  { %539 = vmatpush.bf16.msrb.mxu0 %v792_v25  ;;  %553 = vmatpush.bf16.msrb.mxu1 %v796_v26 }
  0x4a   :  { %567 = vmatpush.bf16.msrb.mxu2 %v800_v27 }
  0x4b   :  { %581 = vmatpush.bf16.msrb.mxu3 %v804_v31 }
  0x4d   :  { %540 = vmatpush.bf16.msrb.mxu0 %v760_v37  ;;  %554 = vmatpush.bf16.msrb.mxu1 %v764_v38  ;;  %v141_v37 = vperm.slane %v1184_v3, 4  ;;  %v142_v38 = vperm.slane %v1184_v3, 5 }
  0x4e   :  { %568 = vmatpush.bf16.msrb.mxu2 %v768_v39 }
  0x4f   :  { %582 = vmatpush.bf16.msrb.mxu3 %v772_v43 }
  0x51   :  { %541 = vmatpush.bf16.msrb.mxu0 %v728_v49  ;;  %555 = vmatpush.bf16.msrb.mxu1 %v732_v51 }
  0x52   :  { %569 = vmatpush.bf16.msrb.mxu2 %v736_v52 }
  0x53   :  { %583 = vmatpush.bf16.msrb.mxu3 %v740_v56 }
  0x55   :  { %542 = vmatpush.bf16.msrb.mxu0 %v696_v62  ;;  %556 = vmatpush.bf16.msrb.mxu1 %v700_v63 }
  0x56   :  { %570 = vmatpush.bf16.msrb.mxu2 %v704_v0 }
  0x57   :  { %584 = vmatpush.bf16.msrb.mxu3 %v708_v1 }
  0x58   :  { %543 = vmatmul.bf16.vlgmr.msrb.gmra.mxu0 %v1174_v50  ;;  %557 = vmatmul.bf16.vlgmr.msrb.gmra.mxu1 %v1174_v50 }
  0x59   :  { %571 = vmatmul.bf16.vlgmr.msrb.gmra.mxu2 %v1174_v50 }
  0x5a   :  { %585 = vmatmul.bf16.vlgmr.msrb.gmra.mxu3 %v1174_v50  ;;  %v594_v50 = vadd.s32 8, %v593_v5 }
  0x5c   :  { %vm603_vm1 = vcmp.lt.s32.totalorder %v594_v50, %v601_v6  ;;  %vm612_vm2 = vcmp.lt.s32.totalorder %v594_v50, %v610_v14 }
  0x5d   :  { %vm1200_vm3 = vmor %vm603_vm1, %vm612_vm2 }
  0xb5   :  { %v488_v8 = vpop.f32.mrf.mxu0  ;;  %v502_v11 = vpop.f32.mrf.mxu1 }
  0xb6   :  { %v489_v10 = vadd.f32 %v488_v8, %v137_v4  ;;  %v503_v12 = vadd.f32 %v502_v11, %v138_v7 }
  0xb8   :  { %v621_v15 = vsel %vm1188_vm0, %v489_v10, 0.0  ;;  %v622_v17 = vsel %vm1188_vm0, %v503_v12, 0.0 }
  0xb9   :  { %637 = vst [vmem:[#allocation10] sm:$0xff] %v621_v15 }
  0xba   :  { %638 = vst [vmem:[#allocation10 + $0x8] sm:$0xff] %v622_v17 }
  0xbd   :  { %v530_v20 = vpop.f32.mrf.mxu3  ;;  %v490_v23 = vpop.f32.mrf.mxu0 }
  0xbe   :  { %v516_v18 = vpop.f32.mrf.mxu2  ;;  %v531_v21 = vadd.f32 %v530_v20, %v140_v16  ;;  %v491_v26 = vadd.f32 %v490_v23, %v137_v4  ;;  %v504_v27 = vpop.f32.mrf.mxu1 }
  0xbf   :  { %v517_v19 = vadd.f32 %v516_v18, %v139_v13  ;;  %v505_v28 = vadd.f32 %v504_v27, %v138_v7 }
  0xc0   :  { %v624_v25 = vsel %vm1188_vm0, %v531_v21, 0.0  ;;  %v629_v29 = vsel %vm1200_vm3, %v491_v26, 0.0 }
  0xc1   :  { %v623_v22 = vsel %vm1188_vm0, %v517_v19, 0.0  ;;  %640 = vst [vmem:[#allocation10 + $0x18] sm:$0xff] %v624_v25  ;;  %v630_v30 = vsel %vm1200_vm3, %v505_v28, 0.0 }
  0xc2   :  { %639 = vst [vmem:[#allocation10 + $0x10] sm:$0xff] %v623_v22 }
  0xc3   :  { %645 = vst [vmem:[#allocation10 + $0x40] sm:$0xff] %v629_v29 }
  0xc4   :  { %646 = vst [vmem:[#allocation10 + $0x48] sm:$0xff] %v630_v30 }
  0xc5   :  { %v532_v33 = vpop.f32.mrf.mxu3 }
  0xc6   :  { %v518_v31 = vpop.f32.mrf.mxu2  ;;  %v533_v34 = vadd.f32 %v532_v33, %v140_v16 }
  0xc7   :  { %v519_v32 = vadd.f32 %v518_v31, %v139_v13 }
  0xc8   :  { %v632_v36 = vsel %vm1200_vm3, %v533_v34, 0.0 }
  0xc9   :  { %v631_v35 = vsel %vm1200_vm3, %v519_v32, 0.0  ;;  %648 = vst [vmem:[#allocation10 + $0x58] sm:$0xff] %v632_v36 }
  0xca   :  { %647 = vst [vmem:[#allocation10 + $0x50] sm:$0xff] %v631_v35 }
  0xd5   :  { %v544_v39 = vpop.f32.mrf.mxu0  ;;  %v558_v41 = vpop.f32.mrf.mxu1 }
  0xd6   :  { %v545_v40 = vadd.f32 %v544_v39, %v141_v37  ;;  %v559_v42 = vadd.f32 %v558_v41, %v142_v38 }
  0xd8   :  { %v625_v43 = vsel %vm1188_vm0, %v545_v40, 0.0  ;;  %v626_v44 = vsel %vm1188_vm0, %v559_v42, 0.0 }
  0xd9   :  { %641 = vst [vmem:[#allocation10 + $0x20] sm:$0xff] %v625_v43 }
  0xda   :  { %642 = vst [vmem:[#allocation10 + $0x28] sm:$0xff] %v626_v44 }
  0xdc   :  { %v572_v47 = vpop.f32.mrf.mxu2 }
  0xdd   :  { %v573_v48 = vadd.f32 %v572_v47, %v143_v45  ;;  %v586_v49 = vpop.f32.mrf.mxu3  ;;  %v546_v51 = vpop.f32.mrf.mxu0 }
  0xde   :  { %v587_v52 = vadd.f32 %v586_v49, %v144_v46  ;;  %v547_v53 = vadd.f32 %v546_v51, %v141_v37  ;;  %v560_v54 = vpop.f32.mrf.mxu1 }
  0xdf   :  { %v627_v55 = vsel %vm1188_vm0, %v573_v48, 0.0  ;;  %v561_v56 = vadd.f32 %v560_v54, %v142_v38 }
  0xe0   :  { %643 = vst [vmem:[#allocation10 + $0x30] sm:$0xff] %v627_v55  ;;  %v628_v57 = vsel %vm1188_vm0, %v587_v52, 0.0  ;;  %v633_v58 = vsel %vm1200_vm3, %v547_v53, 0.0 }
  0xe1   :  { %644 = vst [vmem:[#allocation10 + $0x38] sm:$0xff] %v628_v57  ;;  %v634_v59 = vsel %vm1200_vm3, %v561_v56, 0.0 }
  0xe2   :  { %649 = vst [vmem:[#allocation10 + $0x60] sm:$0xff] %v633_v58 }
  0xe3   :  { %650 = vst [vmem:[#allocation10 + $0x68] sm:$0xff] %v634_v59 }
  0xe4   :  { %v574_v60 = vpop.f32.mrf.mxu2 }
  0xe5   :  { %v575_v61 = vadd.f32 %v574_v60, %v143_v45  ;;  %v588_v62 = vpop.f32.mrf.mxu3 }
  0xe6   :  { %v589_v63 = vadd.f32 %v588_v62, %v144_v46 }
  0xe7   :  { %v635_v0 = vsel %vm1200_vm3, %v575_v61, 0.0 }
  0xe8   :  { %651 = vst [vmem:[#allocation10 + $0x70] sm:$0xff] %v635_v0  ;;  %v636_v1 = vsel %vm1200_vm3, %v589_v63, 0.0 }
  0xe9   :  { %652 = vst [vmem:[#allocation10 + $0x78] sm:$0xff] %v636_v1 }
  0xea   :  { %665 = dma.vmem_to_hbm [thread:$0]  %s658_s12, 2048, %s660_s15, [#allocation6], %s1134_s16, %s1134_s16, %s1130_s30  }
  0xeb   :  { %1123 = dma.done.wait [#allocation6], 2048  }
  0xec   :  { %1124 = vsyncadd [#allocation6], 4294965248 }
  0xed   :  { %670 = vsyncpa [#allocation5], 1 }
  0xee   :  { %671 = vsyncpa [#allocation8], 1 }
  0xef   :  { %672 = vsyncpa [#allocation6], 1 }

</bundles_post_ra>
